<compile_context>
chip_gen: v5e
topology: v5e:2x2
jax: 0.10.0
libtpu: 0.0.40
codegen_flags: <defaults>
</compile_context>

<pallas_src>
import math

import jax
import jax.numpy as jnp
from jax.experimental import pallas as pl
from jax.experimental.pallas import tpu as pltpu

N_BINARY = 5
N_CONTINUOUS = 6
N_FEATURES = N_BINARY + N_CONTINUOUS  # 11


def _round_up(x, m):
    return ((x + m - 1) // m) * m


def _make_kernel(true_b, tile_b, needs_mask):
    """Build the kernel with batch size / tile size baked in at trace time."""
    inv_denom = 1.0 / float(true_b * N_FEATURES)
    # Each of the B * N_CONTINUOUS masked BCE positions contributes log(2)
    # to the mean over B * N_FEATURES elements.
    masked_bce_const = (N_CONTINUOUS / N_FEATURES) * math.log(2.0)

    def kernel(pred_ref, targ_ref, out_ref):
        i = pl.program_id(0)

        @pl.when(i == 0)
        def _init():
            out_ref[...] = jnp.zeros_like(out_ref)

        p = pred_ref[...].astype(jnp.float32)   # (11, tile_b)
        t = targ_ref[...].astype(jnp.float32)

        # --- BCE-with-logits on the 5 binary feature rows (stable form) ---
        x = p[:N_BINARY, :]
        y = t[:N_BINARY, :]
        bce = jnp.maximum(x, 0.0) - x * y + jnp.log1p(jnp.exp(-jnp.abs(x)))

        # --- squared error on the 6 continuous feature rows ----------------
        d = p[N_BINARY:, :] - t[N_BINARY:, :]
        sq = d * d

        if needs_mask:
            # Zero out padded batch lanes (only generated when B % tile != 0).
            col = i * tile_b + jax.lax.broadcasted_iota(
                jnp.int32, (1, tile_b), 1)
            valid = (col < true_b).astype(jnp.float32)   # (1, tile_b)
            bce = bce * valid
            sq = sq * valid

        partial = jnp.sum(bce, keepdims=True) + jnp.sum(sq, keepdims=True)
        out_ref[...] += partial          # resident accumulator block

        @pl.when(i == pl.num_programs(0) - 1)
        def _finalize():
            out_ref[...] = out_ref[...] * inv_denom + masked_bce_const

    return kernel


def combined_differentiable_loss(predictions, targets, tile_b=2048):
    """predictions, targets: (B, 11) float32/bf16. Returns scalar f32 loss."""
    B, F = predictions.shape
    assert F == N_FEATURES, f"expected {N_FEATURES} features, got {F}"

    # Lane-dense layout: batch on the 128-lane axis.  Keep the native dtype
    # (no wrapper-side f32 upcast -- the kernel casts on the VPU).
    p = jnp.transpose(predictions)   # (11, B)
    t = jnp.transpose(targets)

    tb = min(tile_b, _round_up(B, 128))
    bp = _round_up(B, tb)
    if bp != B:
        p = jnp.pad(p, ((0, 0), (0, bp - B)))
        t = jnp.pad(t, ((0, 0), (0, bp - B)))

    kernel = _make_kernel(B, tb, needs_mask=(bp != B))

    out = pl.pallas_call(
        kernel,
        out_shape=jax.ShapeDtypeStruct((1, 1), jnp.float32),
        grid=(bp // tb,),
        in_specs=[
            pl.BlockSpec((N_FEATURES, tb), lambda i: (0, i)),
            pl.BlockSpec((N_FEATURES, tb), lambda i: (0, i)),
        ],
        out_specs=pl.BlockSpec((1, 1), lambda i: (0, 0)),
        compiler_params=pltpu.CompilerParams(
            dimension_semantics=("arbitrary",)),
    )(p, t)
    return out[0, 0]


def _reference_loss(predictions, targets):
    """Pure-JAX reference mirroring the PyTorch module exactly."""
    p = predictions.astype(jnp.float32)
    t = targets.astype(jnp.float32)
    bm = jnp.array([1.0] * N_BINARY + [0.0] * N_CONTINUOUS, jnp.float32)
    cm = 1.0 - bm
    x = p * bm
    y = t * bm
    bce = jnp.maximum(x, 0.0) - x * y + jnp.log1p(jnp.exp(-jnp.abs(x)))
    binary_loss = jnp.mean(bce)
    d = p * cm - t * cm
    continuous_loss = jnp.mean(d * d)
    return binary_loss + continuous_loss


if __name__ == "__main__":
    key = jax.random.PRNGKey(0)
    k1, k2, k3 = jax.random.split(key, 3)

    # --- small case consistent with the module: B=8, 11 features -----------
    B, F = 8, N_FEATURES
    predictions = jax.random.normal(k1, (B, F), dtype=jnp.float32)
    binary_targets = jax.random.bernoulli(k2, 0.5, (B, F)).astype(jnp.float32)
    continuous_targets = jax.random.normal(k3, (B, F), dtype=jnp.float32)
    binary_mask = jnp.array([1.0] * N_BINARY + [0.0] * N_CONTINUOUS,
                            jnp.float32)
    targets = (binary_targets * binary_mask
               + continuous_targets * (1.0 - binary_mask))

    loss = combined_differentiable_loss(predictions, targets)
    loss = jax.block_until_ready(loss)
    ref = _reference_loss(predictions, targets)
    assert jnp.allclose(loss, ref, rtol=1e-5, atol=1e-5), (loss, ref)

    # --- multi-tile case to exercise the grid + remainder-lane masking -----
    B2 = 300
    k4, k5 = jax.random.split(k3)
    pred2 = jax.random.normal(k4, (B2, F), dtype=jnp.float32)
    targ2 = jax.random.normal(k5, (B2, F), dtype=jnp.float32)
    loss2 = combined_differentiable_loss(pred2, targ2, tile_b=128)
    loss2 = jax.block_until_ready(loss2)
    ref2 = _reference_loss(pred2, targ2)
    assert jnp.allclose(loss2, ref2, rtol=1e-5, atol=1e-5), (loss2, ref2)

    print("KERNEL_OK")
</pallas_src>

<mosaic_0001>
module attributes {stable_mosaic.version = 11 : i64} {
  func.func @kernel(%arg0: i32, %arg1: memref<11x128xf32, #tpu.memory_space<vmem>>, %arg2: memref<11x128xf32, #tpu.memory_space<vmem>>, %arg3: memref<1x1xf32, #tpu.memory_space<vmem>>) attributes {dimension_semantics = [#tpu.dimension_semantics<arbitrary>], iteration_bounds = array<i64: 1>, scalar_prefetch = 0 : i64, scratch_operands = 0 : i64, tpu.core_type = #tpu.core_type<tc>, window_params = [{transform_indices = @transform_0, window_bounds = array<i64: 11, 128>}, {transform_indices = @transform_1, window_bounds = array<i64: 11, 128>}, {pipeline_mode = #tpu.pipeline_mode<synchronous>, transform_indices = @transform_2, window_bounds = array<i64: 1, 1>}]} {
    %c0_i32 = arith.constant 0 : i32
    %0 = arith.cmpi eq, %arg0, %c0_i32 : i32
    %1 = arith.extui %0 : i1 to i32
    %c0_i32_0 = arith.constant 0 : i32
    %2 = arith.cmpi ne, %1, %c0_i32_0 : i32
    scf.if %2 {
      %cst_13 = arith.constant 0.000000e+00 : f32
      %50 = vector.broadcast %cst_13 : f32 to vector<1x1xf32>
      %c0_14 = arith.constant 0 : index
      %c0_15 = arith.constant 0 : index
      %51 = vector.load %arg3[%c0_14, %c0_15] : memref<1x1xf32, #tpu.memory_space<vmem>>, vector<1x1xf32>
      tpu.vector_store %arg3[%c0_14, %c0_15], %50 {strides = array<i32>} : memref<1x1xf32, #tpu.memory_space<vmem>>, vector<1x1xf32>,
    } else {
    }
    %c0 = arith.constant 0 : index
    %c0_1 = arith.constant 0 : index
    %3 = vector.load %arg1[%c0, %c0_1] : memref<11x128xf32, #tpu.memory_space<vmem>>, vector<11x128xf32>
    %c0_2 = arith.constant 0 : index
    %c0_3 = arith.constant 0 : index
    %4 = vector.load %arg2[%c0_2, %c0_3] : memref<11x128xf32, #tpu.memory_space<vmem>>, vector<11x128xf32>
    %5 = vector.extract_strided_slice %3 {offsets = [0, 0], sizes = [5, 128], strides = [1, 1]} : vector<11x128xf32> to vector<5x128xf32>
    %6 = vector.extract_strided_slice %4 {offsets = [0, 0], sizes = [5, 128], strides = [1, 1]} : vector<11x128xf32> to vector<5x128xf32>
    %cst = arith.constant 0.000000e+00 : f32
    %7 = vector.broadcast %cst : f32 to vector<5x128xf32>
    %8 = arith.maximumf %5, %7 : vector<5x128xf32>
    %9 = arith.mulf %5, %6 : vector<5x128xf32>
    %10 = arith.subf %8, %9 : vector<5x128xf32>
    %11 = math.absf %5 : vector<5x128xf32>
    %cst_4 = arith.constant 0.000000e+00 : f32
    %12 = vector.broadcast %cst_4 : f32 to vector<5x128xf32>
    %13 = arith.subf %12, %11 : vector<5x128xf32>
    %14 = math.exp %13 : vector<5x128xf32>
    %15 = math.log1p %14 : vector<5x128xf32>
    %16 = arith.addf %10, %15 : vector<5x128xf32>
    %17 = vector.extract_strided_slice %3 {offsets = [5, 0], sizes = [6, 128], strides = [1, 1]} : vector<11x128xf32> to vector<6x128xf32>
    %18 = vector.extract_strided_slice %4 {offsets = [5, 0], sizes = [6, 128], strides = [1, 1]} : vector<11x128xf32> to vector<6x128xf32>
    %19 = arith.subf %17, %18 : vector<6x128xf32>
    %20 = arith.mulf %19, %19 : vector<6x128xf32>
    %c128_i32 = arith.constant 128 : i32
    %21 = arith.muli %arg0, %c128_i32 : i32
    %22 = tpu.iota {dimensions = array<i32: 1>} : vector<1x128xi32>
    %23 = vector.broadcast %21 : i32 to vector<1x128xi32>
    %24 = arith.addi %23, %22 : vector<1x128xi32>
    %c8_i32 = arith.constant 8 : i32
    %25 = vector.broadcast %c8_i32 : i32 to vector<1x128xi32>
    %26 = arith.cmpi slt, %24, %25 : vector<1x128xi32>
    %27 = arith.extui %26 : vector<1x128xi1> to vector<1x128xi32>
    %28 = arith.sitofp %27 : vector<1x128xi32> to vector<1x128xf32>
    %29 = vector.broadcast %28 : vector<1x128xf32> to vector<5x128xf32>
    %30 = arith.mulf %16, %29 : vector<5x128xf32>
    %31 = vector.broadcast %28 : vector<1x128xf32> to vector<6x128xf32>
    %32 = arith.mulf %20, %31 : vector<6x128xf32>
    %33 = vector.shape_cast %30 : vector<5x128xf32> to vector<1x5x128xf32>
    %cst_5 = arith.constant dense<0.000000e+00> : vector<1xf32>
    %34 = vector.multi_reduction <add>, %33, %cst_5 [1, 2] : vector<1x5x128xf32> to vector<1xf32>
    %35 = vector.shape_cast %34 : vector<1xf32> to vector<1x1x1xf32>
    %36 = vector.extract %35[0, 0, 0] : f32 from vector<1x1x1xf32>
    %37 = vector.broadcast %36 : f32 to vector<1x1xf32>
    %38 = vector.shape_cast %32 : vector<6x128xf32> to vector<1x6x128xf32>
    %cst_6 = arith.constant dense<0.000000e+00> : vector<1xf32>
    %39 = vector.multi_reduction <add>, %38, %cst_6 [1, 2] : vector<1x6x128xf32> to vector<1xf32>
    %40 = vector.shape_cast %39 : vector<1xf32> to vector<1x1x1xf32>
    %41 = vector.extract %40[0, 0, 0] : f32 from vector<1x1x1xf32>
    %42 = vector.broadcast %41 : f32 to vector<1x1xf32>
    %43 = arith.addf %37, %42 : vector<1x1xf32>
    %c0_7 = arith.constant 0 : index
    %c0_8 = arith.constant 0 : index
    %44 = vector.load %arg3[%c0_7, %c0_8] : memref<1x1xf32, #tpu.memory_space<vmem>>, vector<1x1xf32>
    %45 = arith.addf %44, %43 : vector<1x1xf32>
    %c0_9 = arith.constant 0 : index
    %c0_10 = arith.constant 0 : index
    %46 = vector.load %arg3[%c0_9, %c0_10] : memref<1x1xf32, #tpu.memory_space<vmem>>, vector<1x1xf32>
    tpu.vector_store %arg3[%c0_9, %c0_10], %45 {strides = array<i32>} : memref<1x1xf32, #tpu.memory_space<vmem>>, vector<1x1xf32>,
    %c0_i32_11 = arith.constant 0 : i32
    %47 = arith.cmpi eq, %arg0, %c0_i32_11 : i32
    %48 = arith.extui %47 : i1 to i32
    %c0_i32_12 = arith.constant 0 : i32
    %49 = arith.cmpi ne, %48, %c0_i32_12 : i32
    scf.if %49 {
      %c0_13 = arith.constant 0 : index
      %c0_14 = arith.constant 0 : index
      %50 = vector.load %arg3[%c0_13, %c0_14] : memref<1x1xf32, #tpu.memory_space<vmem>>, vector<1x1xf32>
      %cst_15 = arith.constant 0.0113636367 : f32
      %51 = vector.broadcast %cst_15 : f32 to vector<1x1xf32>
      %52 = arith.mulf %50, %51 : vector<1x1xf32>
      %cst_16 = arith.constant 0.378080279 : f32
      %53 = vector.broadcast %cst_16 : f32 to vector<1x1xf32>
      %54 = arith.addf %52, %53 : vector<1x1xf32>
      %c0_17 = arith.constant 0 : index
      %c0_18 = arith.constant 0 : index
      %55 = vector.load %arg3[%c0_17, %c0_18] : memref<1x1xf32, #tpu.memory_space<vmem>>, vector<1x1xf32>
      tpu.vector_store %arg3[%c0_17, %c0_18], %54 {strides = array<i32>} : memref<1x1xf32, #tpu.memory_space<vmem>>, vector<1x1xf32>,
    } else {
    }
    return
  }
  func.func @transform_0(%arg0: i32) -> (i32, i32) {
    %c0_i32 = arith.constant 0 : i32
    %c0_i32_0 = arith.constant 0 : i32
    return %c0_i32, %arg0 : i32, i32
  }
  func.func @transform_1(%arg0: i32) -> (i32, i32) {
    %c0_i32 = arith.constant 0 : i32
    %c0_i32_0 = arith.constant 0 : i32
    return %c0_i32, %arg0 : i32, i32
  }
  func.func @transform_2(%arg0: i32) -> (i32, i32) {
    %c0_i32 = arith.constant 0 : i32
    %c0_i32_0 = arith.constant 0 : i32
    %c0_i32_1 = arith.constant 0 : i32
    return %c0_i32, %c0_i32_0 : i32, i32
  }
}

</mosaic_0001>

<bundles_post_ra>
// kernel: tpu_custom_call.1
= control target key start
LH: loop header
LB: loop body
LE: loop exit
PB: predicated region body
PF: predicated region fallthrough
CT: control target
= control target key end

     0   :  { %7 = vsyncpa [#allocation3], 0  ;;  %s273_s0 = inlined_call_operand.hbm [shape: f32[11,128], index: 0, kind: input, shape index: {}]   ;;  %s274_s1 = inlined_call_operand.hbm [shape: f32[11,128], index: 1, kind: input, shape index: {}]   ;;  %s275_s2 = inlined_call_operand.hbm [shape: f32[1,1], index: 2, kind: output, shape index: {}]  }
   0x1   :  { %8 = vsyncpa [#allocation6], 0 }
   0x2   :  { %9 = vsyncpa [#allocation4], 0  ;;  %s14_s11 = sshll.u32 %s273_s0, 4  ;;  %s240_s12 = smov [#allocation2]   ;;  %s15_s11 = int_to_ptr.hbm [resolvable:$true] %s14_s11 }
   0x3   :  { %s16_s13 = sshll.u32 %s240_s12, 4  ;;  %s27_s16 = sshll.u32 %s274_s1, 4  ;;  %s17_s13 = int_to_ptr.vmem [resolvable:$true] %s16_s13  ;;  %s28_s16 = int_to_ptr.hbm [resolvable:$true] %s27_s16 }
   0x4   :  { %s241_s17 = smov 128   ;;  %s242_s18 = smov 8  }
   0x5   :  { %22 = dma.hbm_to_vmem [thread:$0]  %s15_s11, 256, %s17_s13, [#allocation3], %s241_s17, %s241_s17, %s242_s18  }
   0x6   :  { %s243_s19 = smov [#allocation5]  }
   0x7   :  { %s29_s20 = sshll.u32 %s243_s19, 4  ;;  %s30_s20 = int_to_ptr.vmem [resolvable:$true] %s29_s20 }
   0x8   :  { %35 = dma.hbm_to_vmem [thread:$0]  %s28_s16, 256, %s30_s20, [#allocation6], %s241_s17, %s241_s17, %s242_s18  }
   0x9   :  { %234 = dma.done.wait [#allocation3], 256  }
   0xa   :  { %235 = vsyncadd [#allocation3], 4294967040 }
   0xb   :  { %236 = dma.done.wait [#allocation6], 256  }
   0xc   :  { %237 = vsyncadd [#allocation6], 4294967040  ;;  %vm48_vm0 = vcmask 0   ;;  %v244_v0 = vmov 0.0   ;;  %v50_v1 = vld [vmem:[#allocation2] sm:$0xff]  ;;  %v76_v6 = vlaneseq  ;;  %v52_v11 = vld [vmem:[#allocation5] sm:$0xff] }
   0xd   :  { %49 = vst.msk [vmem:[#allocation7] sm:$0x1] %vm48_vm0, %v244_v0  ;;  %v57_v2 = vand.u32 2147483647, %v50_v1  ;;  %v51_v7 = vld [vmem:[#allocation2 + $0x8] sm:$0x7]  ;;  %v71_v13 = vsub.f32 %v50_v1, %v52_v11  ;;  %v55_v17 = vmul.f32 %v52_v11, %v50_v1 }
   0xe   :  { %v53_v8 = vld [vmem:[#allocation5 + $0x8] sm:$0x7]  ;;  %v77_v15 = vand.u32 127, %v76_v6  ;;  %v54_v16 = vmax.f32 %v50_v1, 0.0  ;;  %vm86_vm3 = vcmask 1044480   ;;  %vm100_vm4 = vcmask 1042432  }
   0xf   :  { %v58_v3 = vsub.f32 0.0, %v57_v2  ;;  %v72_v14 = vsub.f32 %v51_v7, %v53_v8  ;;  %v73_v20 = vmul.f32 %v71_v13, %v71_v13  ;;  %vm105_vm5 = vcmask 1045504   ;;  %s245_s21 = smov [#allocation7]   ;;  %s136_s25 = sshll.u32 %s275_s2, 4  ;;  %s137_s25 = int_to_ptr.hbm [resolvable:$true] %s136_s25 }
  0x10   :  { %vm80_vm1 = vcmp.lt.s32.totalorder %v77_v15, 8  ;;  %v56_v23 = vsub.f32 %v54_v16, %v55_v17  ;;  %s134_s22 = sshll.u32 %s245_s21, 4  ;;  %s135_s22 = int_to_ptr.vmem [resolvable:$true] %s134_s22 }
  0x11   :  { %v59_v4 = vmul.f32 1.442695, %v58_v3  ;;  %v74_v21 = vmul.f32 %v72_v14, %v72_v14  ;;  %v147_v25 = vsel %vm80_vm1, 1.0, %v244_v0 }
  0x12   :  { %v84_v27 = vmul.f32 %v147_v25, %v73_v20 }
  0x13   :  { %158 = vpow2.f32 %v59_v4  ;;  %v85_v28 = vmul.f32 %v147_v25, %v74_v21 }
  0x14   :  { %v101_v31 = vrot.slane %v84_v27, 5  ;;  %v118_v52 = vld [vmem:[#allocation7] sm:$0x1] }
  0x15   :  { %v102_v32 = vrot.slane %v85_v28, 5 }
  0x17   :  { %v103_v34 = vsel %vm100_vm4, %v101_v31, %v102_v32 }
  0x18   :  { %v106_v35 = vsel %vm105_vm5, %v103_v34, 0.0 }
  0x19   :  { %v159_v5 = vpop.eup %158 }
  0x1a   :  { %v61_v9 = vadd.f32 1.0, %v159_v5  ;;  %v64_v10 = vmul.f32 -0.5, %v159_v5  ;;  %v67_v18 = vand.u32 2147483647, %v159_v5 }
  0x1c   :  { %160 = vlog2.f32 %v61_v9  ;;  %v65_v12 = vadd.f32 1.0, %v64_v10  ;;  %vm68_vm2 = vcmp.lt.f32.partialorder %v67_v18, 0.0004427343 }
  0x1e   :  { %v66_v19 = vmul.f32 %v159_v5, %v65_v12 }
  0x22   :  { %v161_v22 = vpop.eup %160 }
  0x23   :  { %v63_v24 = vmul.f32 0.6931472, %v161_v22 }
  0x25   :  { %v69_v26 = vsel %vm68_vm2, %v66_v19, %v63_v24 }
  0x26   :  { %v70_v29 = vadd.f32 %v69_v26, %v56_v23 }
  0x28   :  { %v83_v30 = vmul.f32 %v147_v25, %v70_v29 }
  0x2a   :  { %v87_v33 = vsel %vm86_vm3, %v83_v30, 0.0 }
  0x2b   :  { %88 = vadd.xlane.f32.xlu0 %v87_v33 }
  0x33   :  { %107 = vadd.xlane.f32.xlu0 %v106_v35 }
  0x9e   :  { %v89_v36 = vpop.xlane.xlu0 %88 }
  0x9f   :  { %v90_v37 = vrot.slane %v89_v36, 4 }
  0xa1   :  { %v91_v38 = vadd.f32 %v90_v37, %v89_v36 }
  0xa3   :  { %v92_v39 = vrot.slane %v91_v38, 2 }
  0xa5   :  { %v93_v40 = vadd.f32 %v92_v39, %v91_v38 }
  0xa6   :  { %v108_v41 = vpop.xlane.xlu0 %107 }
  0xa7   :  { %v109_v42 = vrot.slane %v108_v41, 4  ;;  %v94_v43 = vrot.slane %v93_v40, 1 }
  0xa9   :  { %v110_v44 = vadd.f32 %v109_v42, %v108_v41  ;;  %v95_v45 = vadd.f32 %v94_v43, %v93_v40 }
  0xab   :  { %v111_v46 = vrot.slane %v110_v44, 2  ;;  %148 = vpush %v95_v45 }
  0xad   :  { %v112_v47 = vadd.f32 %v111_v46, %v110_v44 }
  0xaf   :  { %v113_v48 = vrot.slane %v112_v47, 1 }
  0xb1   :  { %v114_v49 = vadd.f32 %v113_v48, %v112_v47 }
  0xb3   :  { %150 = vpush %v114_v49 }
  0xdc   :  { %s149_s0 = spop %148 }
  0xdd   :  { %v97_v50 = vstv %s149_s0 }
  0xe4   :  { %s151_s1 = spop %150 }
  0xe5   :  { %v116_v51 = vstv %s151_s1 }
  0xe6   :  { %v117_v53 = vadd.f32 %v116_v51, %v97_v50 }
  0xe8   :  { %v119_v54 = vadd.f32 %v118_v52, %v117_v53 }
  0xea   :  { %121 = vst.msk [vmem:[#allocation7] sm:$0x1] %vm48_vm0, %v119_v54 }
  0xf1   :  { %v125_v55 = vld [vmem:[#allocation7] sm:$0x1] }
  0xf2   :  { %v126_v56 = vmul.f32 0.011363637, %v125_v55 }
  0xf4   :  { %v127_v57 = vadd.f32 0.37808028, %v126_v56 }
  0xf6   :  { %128 = vst.msk [vmem:[#allocation7] sm:$0x1] %vm48_vm0, %v127_v57 }
  0xf7   :  { %139 = dma.vmem_to_hbm [thread:$0]  %s135_s22, 16, %s137_s25, [#allocation4]  }
  0xf8   :  { %238 = dma.done.wait [#allocation4], 16  }
  0xf9   :  { %239 = vsyncadd [#allocation4], 4294967280 }
  0xfa   :  { %144 = vsyncpa [#allocation3], 1 }
  0xfb   :  { %145 = vsyncpa [#allocation6], 1 }
  0xfc   :  { %146 = vsyncpa [#allocation4], 1 }

</bundles_post_ra>
